<compile_context>
chip_gen: v5e
topology: v5e:2x2
jax: 0.10.0
libtpu: 0.0.40
codegen_flags: <defaults>
</compile_context>

<pallas_src>
import numpy as np
import jax
import jax.numpy as jnp
from jax.experimental import pallas as pl
from jax.experimental.pallas import tpu as pltpu


_LANE = 128
_MAX_LANE_TILE = 16384  # samples per grid step: 64 KiB in + 512 KiB out per buffer


def concept_decode_kernel(codes_ref, out_ref):
    # codes_ref: (1, T) int32 packed codes (d1*16 + d2), one sample per lane.
    # out_ref  : (8, T) float32; row i = bit (7 - i) of the code (MSB-first),
    #            i.e. [b3(d1), b2(d1), b1(d1), b0(d1), b3(d2), ..., b0(d2)]
    #            down the sublane axis for each sample (lane).
    codes = codes_ref[...]                                            # (1, T) int32
    bit_row = jax.lax.broadcasted_iota(jnp.int32, out_ref.shape, 0)   # (8, T): 0..7
    bits = jnp.right_shift(codes, 7 - bit_row) & 1                    # (8, T) in {0,1}
    out_ref[...] = bits.astype(jnp.float32)


def mnist_add_concepts(indices, gt_table):
    """indices: (B,) int image indices; gt_table: (N, 2) int digit labels (0..9).
    Returns (B, 8) float32 binary concept vectors."""
    B = int(indices.shape[0])
    N = int(gt_table.shape[0])

    # Pack each (d1, d2) row into one int32 code; code bits 7..0 == concept bits.
    gt_i32 = gt_table.astype(jnp.int32)
    codes = gt_i32[:, 0] * 16 + gt_i32[:, 1]                  # (N,)

    # Reference would raise on OOB indices; clamp so the gather stays in bounds.
    idx = jnp.clip(indices.astype(jnp.int32), 0, N - 1)

    # Wrapper-side gather: one contiguous gather instead of B tiny gather DMAs.
    codes_g = jnp.take(codes, idx, axis=0)                    # (B,) int32

    # Lane-dense padding: one sample per lane, padded to a lane-tile multiple.
    b_pad = pl.cdiv(B, _LANE) * _LANE
    tile_n = min(b_pad, _MAX_LANE_TILE)
    b_pad = pl.cdiv(b_pad, tile_n) * tile_n
    codes_slab = jnp.pad(codes_g, (0, b_pad - B)).reshape(1, b_pad)

    out = pl.pallas_call(
        concept_decode_kernel,
        out_shape=jax.ShapeDtypeStruct((8, b_pad), jnp.float32),
        grid=(b_pad // tile_n,),
        in_specs=[pl.BlockSpec((1, tile_n), lambda i: (0, i))],
        out_specs=pl.BlockSpec((8, tile_n), lambda i: (0, i)),
        compiler_params=pltpu.CompilerParams(
            dimension_semantics=("parallel",)),
    )(codes_slab)

    # (8, b_pad) -> (B, 8): tiny layout transpose/slice in the wrapper.
    return out[:, :B].T


def _reference_concepts(indices_np, gt_np):
    out = []
    for idx in indices_np:
        d1 = int(gt_np[int(idx), 0])
        d2 = int(gt_np[int(idx), 1])
        concept = [int(b) for b in format(d1, "04b")] + \
                  [int(b) for b in format(d2, "04b")]
        out.append(concept)
    return np.asarray(out, dtype=np.float32)


if __name__ == "__main__":
    key = jax.random.PRNGKey(0)
    k_gt, k_idx = jax.random.split(key)

    # Synthetic "dataset.real_concepts": N samples, each a pair of digits 0..9.
    N = 64
    B = 8
    gt_table = jax.random.randint(k_gt, (N, 2), 0, 10, dtype=jnp.int32)
    indices = jax.random.randint(k_idx, (B,), 0, N, dtype=jnp.int32)

    out = mnist_add_concepts(indices, gt_table)
    out = jax.block_until_ready(out)

    ref = _reference_concepts(np.asarray(indices), np.asarray(gt_table))
    np.testing.assert_allclose(np.asarray(out), ref, atol=0.0, rtol=0.0)

    print("KERNEL_OK")
</pallas_src>

<mosaic_0001>
module attributes {stable_mosaic.version = 11 : i64} {
  func.func @concept_decode_kernel(%arg0: i32, %arg1: memref<1x128xi32, #tpu.memory_space<vmem>>, %arg2: memref<8x128xf32, #tpu.memory_space<vmem>>) attributes {dimension_semantics = [#tpu.dimension_semantics<parallel>], iteration_bounds = array<i64: 1>, scalar_prefetch = 0 : i64, scratch_operands = 0 : i64, tpu.core_type = #tpu.core_type<tc>, window_params = [{transform_indices = @transform_0, window_bounds = array<i64: 1, 128>}, {transform_indices = @transform_1, window_bounds = array<i64: 8, 128>}]} {
    %c0 = arith.constant 0 : index
    %c0_0 = arith.constant 0 : index
    %0 = vector.load %arg1[%c0, %c0_0] : memref<1x128xi32, #tpu.memory_space<vmem>>, vector<1x128xi32>
    %1 = tpu.iota {dimensions = array<i32: 0>} : vector<8x128xi32>
    %c7_i32 = arith.constant 7 : i32
    %2 = vector.broadcast %c7_i32 : i32 to vector<8x128xi32>
    %3 = arith.subi %2, %1 : vector<8x128xi32>
    %4 = vector.broadcast %0 : vector<1x128xi32> to vector<8x128xi32>
    %5 = arith.shrsi %4, %3 : vector<8x128xi32>
    %c1_i32 = arith.constant 1 : i32
    %6 = vector.broadcast %c1_i32 : i32 to vector<8x128xi32>
    %7 = arith.andi %5, %6 : vector<8x128xi32>
    %8 = arith.sitofp %7 : vector<8x128xi32> to vector<8x128xf32>
    %c0_1 = arith.constant 0 : index
    %c0_2 = arith.constant 0 : index
    %9 = vector.load %arg2[%c0_1, %c0_2] : memref<8x128xf32, #tpu.memory_space<vmem>>, vector<8x128xf32>
    tpu.vector_store %arg2[%c0_1, %c0_2], %8 {strides = array<i32>} : memref<8x128xf32, #tpu.memory_space<vmem>>, vector<8x128xf32>,
    return
  }
  func.func @transform_0(%arg0: i32) -> (i32, i32) {
    %c0_i32 = arith.constant 0 : i32
    %c0_i32_0 = arith.constant 0 : i32
    return %c0_i32, %arg0 : i32, i32
  }
  func.func @transform_1(%arg0: i32) -> (i32, i32) {
    %c0_i32 = arith.constant 0 : i32
    %c0_i32_0 = arith.constant 0 : i32
    return %c0_i32, %arg0 : i32, i32
  }
}

</mosaic_0001>

<bundles_post_ra>
// kernel: tpu_custom_call.1
= control target key start
LH: loop header
LB: loop body
LE: loop exit
PB: predicated region body
PF: predicated region fallthrough
CT: control target
= control target key end

     0   :  { %6 = vsyncpa [#allocation3], 0  ;;  %s122_s0 = inlined_call_operand.hbm [shape: s32[1,128], index: 0, kind: input, shape index: {}]   ;;  %s123_s1 = inlined_call_operand.hbm [shape: f32[8,128], index: 1, kind: output, shape index: {}]  }
   0x1   :  { %7 = vsyncpa [#allocation4], 0  ;;  %s13_s8 = sshll.u32 %s122_s0, 4  ;;  %s104_s9 = smov [#allocation2]   ;;  %s14_s8 = int_to_ptr.hbm [resolvable:$true] %s13_s8 }
   0x2   :  { %s15_s10 = sshll.u32 %s104_s9, 4  ;;  %s16_s10 = int_to_ptr.vmem [resolvable:$true] %s15_s10 }
   0x3   :  { %18 = dma.hbm_to_vmem [thread:$0]  %s14_s8, 16, %s16_s10, [#allocation3]  }
   0x4   :  { %100 = dma.done.wait [#allocation3], 16  }
   0x5   :  { %101 = vsyncadd [#allocation3], 4294967280  ;;  %v24_v0 = vlaneseq  ;;  %v51_v3 = vld [vmem:[#allocation2] ss:$0 sm:$0xff]  ;;  %s105_s11 = smov [#allocation5]   ;;  %s39_s15 = sshll.u32 %s123_s1, 4  ;;  %s40_s15 = int_to_ptr.hbm [resolvable:$true] %s39_s15 }
   0x6   :  { %s37_s12 = sshll.u32 %s105_s11, 4  ;;  %s38_s12 = int_to_ptr.vmem [resolvable:$true] %s37_s12 }
   0x7   :  { %v25_v1 = vshrl.u32 %v24_v0, 7 }
   0x9   :  { %v26_v2 = vsub.s32 7, %v25_v1 }
   0xb   :  { %v28_v4 = vshra.s32 %v51_v3, %v26_v2 }
   0xd   :  { %v29_v5 = vand.u32 1, %v28_v4 }
   0xf   :  { %v30_v6 = vcvt.s32.f32 %v29_v5 }
  0x11   :  { %31 = vst [vmem:[#allocation5] sm:$0xff] %v30_v6 }
  0x12   :  { %42 = dma.vmem_to_hbm [thread:$0]  %s38_s12, 128, %s40_s15, [#allocation4]  }
  0x13   :  { %102 = dma.done.wait [#allocation4], 128  }
  0x14   :  { %103 = vsyncadd [#allocation4], 4294967168 }
  0x15   :  { %47 = vsyncpa [#allocation3], 1 }
  0x16   :  { %48 = vsyncpa [#allocation4], 1 }

</bundles_post_ra>
